<compile_context>
chip_gen: v6e
topology: v6e:2x2x1
jax: 0.10.0
libtpu: 0.0.40
codegen_flags: <defaults>
</compile_context>

<pallas_src>
import functools
import math

import jax
import jax.numpy as jnp
from jax import lax
from jax.experimental import pallas as pl
from jax.experimental.pallas import tpu as pltpu

_NEG = -1e30  # finite "minus infinity": exp(x - m) underflows to 0, never NaN


def _round_up(x, m):
    return ((x + m - 1) // m) * m


def _arcface_kernel(emb_ref, w_ref, cs_ref, lbl_ref, out_ref,
                    m_sc, l_sc, t_sc, *,
                    cos_m, sin_m, scale, c_tile, c_actual, c_padded):
    ci = pl.program_id(1)

    @pl.when(ci == 0)
    def _init():
        m_sc[...] = jnp.full_like(m_sc, _NEG)
        l_sc[...] = jnp.zeros_like(l_sc)
        t_sc[...] = jnp.zeros_like(t_sc)

    emb = emb_ref[...]                 # (Bt, E)  raw dtype, MXU operand
    w = w_ref[...]                     # (Ct, E)  raw (un-normalized) weight

    # scale * cos_theta.  The per-class 1/||w|| and the ArcFace scale are both
    # folded into the precomputed (1, Ct) col_scale vector, so the weight tile
    # feeds the MXU untouched (f32 accumulation) and the only per-element VPU
    # work here is a single multiply by a lane-dense row vector.
    raw = lax.dot_general(
        emb, w,
        dimension_numbers=(((1,), (1,)), ((), ())),
        preferred_element_type=jnp.float32)                     # (Bt, Ct)
    scaled = raw * cs_ref[...]                                  # scale * cos

    labels = lbl_ref[...]                                       # (Bt, 1) int32
    col_global = ci * c_tile + lax.broadcasted_iota(
        jnp.int32, scaled.shape, 1)
    one_hot = col_global == labels                              # (Bt, Ct)

    # Extract the target cosine (one full-tile select + lane reduce); all
    # margin math happens on (Bt, 1) vectors only.
    tgt_scaled = jnp.sum(jnp.where(one_hot, scaled, 0.0), axis=1, keepdims=True)
    tgt_cos = tgt_scaled * (1.0 / scale)
    sin_tgt = jnp.sqrt(jnp.clip(1.0 - tgt_cos * tgt_cos, 0.0, 1.0))
    tgt_m_scaled = (tgt_cos * cos_m - sin_tgt * sin_m) * scale  # (Bt, 1)

    logits = jnp.where(one_hot, tgt_m_scaled, scaled)           # (Bt, Ct)

    if c_padded != c_actual:  # static: only the final C tile holds padding
        logits = lax.cond(
            ci == pl.num_programs(1) - 1,
            lambda lg, cg: jnp.where(cg < c_actual, lg, _NEG),
            lambda lg, cg: lg,
            logits, col_global)

    # Online logsumexp across the streamed C tiles.
    m_prev = m_sc[...]
    m_new = jnp.maximum(m_prev, jnp.max(logits, axis=1, keepdims=True))
    alpha = jnp.exp(m_prev - m_new)
    p_sum = jnp.sum(jnp.exp(logits - m_new), axis=1, keepdims=True)
    l_new = alpha * l_sc[...] + p_sum

    # Target-logit accumulator: the target logit is already known from
    # tgt_m_scaled, so no second full-tile masked reduce -- just a (Bt, 1)
    # "is the label in this C tile" predicate.
    c_lo = ci * c_tile
    has_tgt = jnp.logical_and(labels >= c_lo, labels < c_lo + c_tile)
    t_new = t_sc[...] + jnp.where(has_tgt, tgt_m_scaled, 0.0)

    m_sc[...] = m_new
    l_sc[...] = l_new
    t_sc[...] = t_new

    @pl.when(ci == pl.num_programs(1) - 1)
    def _finalize():
        # per-row cross-entropy: logsumexp(logits) - target_logit
        out_ref[...] = (m_new + jnp.log(l_new) - t_new).astype(out_ref.dtype)


def arcface_loss(embeddings, weight, labels, *, scale=30.0, margin=0.5,
                 b_tile=None, c_tile=None):
    B, E = embeddings.shape
    C, E2 = weight.shape
    assert E == E2

    w_bytes = jnp.dtype(weight.dtype).itemsize
    e_bytes = jnp.dtype(embeddings.dtype).itemsize

    if b_tile is None:
        # One batch tile when possible: the (C, E) weight is then read from
        # HBM exactly once.  (On v7x pass b_tile ~ round_up(ceil(B/2), 8) so
        # the "parallel" batch axis feeds both TensorCores.)
        b_tile = min(_round_up(B, 8), 512)
    b_tile = _round_up(b_tile, 8)

    if c_tile is None:
        # 256-aligned (v6e/v7x 2x256 MXU; also a multiple of v5e's 128) and
        # sized so the double-buffered weight stream stays within ~24 MiB
        # (fits v7x's 32 MiB scoped / 64 MiB physical VMEM with headroom).
        by_budget = max(256, ((24 << 20) // (2 * E * w_bytes)) // 256 * 256)
        c_tile = int(min(2048, by_budget, _round_up(C, 256)))
    c_tile = _round_up(c_tile, 8)
    if _round_up(C, c_tile) != c_tile:
        # More than one C tile: keep the (1, c_tile) col_scale block lane-legal.
        c_tile = _round_up(c_tile, 128)

    b_pad = _round_up(B, b_tile)
    c_pad = _round_up(C, c_tile)

    emb_p = embeddings if b_pad == B else jnp.pad(
        embeddings, ((0, b_pad - B), (0, 0)))
    w_p = weight if c_pad == C else jnp.pad(weight, ((0, c_pad - C), (0, 0)))

    # Precompute scale * 1/||w_c|| once (f32, 1e-12 norm floor as in
    # F.normalize) -- streamed as a tiny lane-dense (1, c_tile) block.
    w_f32 = weight.astype(jnp.float32)
    inv_norm = lax.rsqrt(jnp.maximum(jnp.sum(w_f32 * w_f32, axis=1), 1e-24))
    col_scale = (float(scale) * inv_norm).reshape(1, C)
    cs_p = col_scale if c_pad == C else jnp.pad(
        col_scale, ((0, 0), (0, c_pad - C)))

    lbl_p = labels.astype(jnp.int32).reshape(-1, 1)
    if b_pad != B:
        lbl_p = jnp.pad(lbl_p, ((0, b_pad - B), (0, 0)))

    kernel = functools.partial(
        _arcface_kernel,
        cos_m=float(math.cos(margin)),
        sin_m=float(math.sin(margin)),
        scale=float(scale),
        c_tile=c_tile,
        c_actual=C,
        c_padded=c_pad,
    )

    grid = (b_pad // b_tile, c_pad // c_tile)   # (parallel batch, C reduction)

    # Explicit VMEM budget for the chosen tiles (double-buffered operands +
    # scratch + in-kernel f32 temporaries), clamped for v7x headroom.
    est = (2 * c_tile * E * w_bytes
           + 2 * b_tile * E * e_bytes
           + 2 * c_tile * 4
           + 4 * b_tile * 4
           + 3 * b_tile * 4
           + 6 * b_tile * c_tile * 4)
    vmem_limit = int(min(max(est * 5 // 4, 32 << 20), 96 << 20))

    per_row = pl.pallas_call(
        kernel,
        out_shape=jax.ShapeDtypeStruct((b_pad, 1), jnp.float32),
        grid_spec=pltpu.PrefetchScalarGridSpec(
            num_scalar_prefetch=0,
            grid=grid,
            in_specs=[
                pl.BlockSpec((b_tile, E), lambda bi, ci: (bi, 0)),   # embeddings
                pl.BlockSpec((c_tile, E), lambda bi, ci: (ci, 0)),   # weight (streamed over C)
                pl.BlockSpec((1, c_tile), lambda bi, ci: (0, ci)),   # scale/||w|| per class
                pl.BlockSpec((b_tile, 1), lambda bi, ci: (bi, 0)),   # labels
            ],
            out_specs=pl.BlockSpec((b_tile, 1), lambda bi, ci: (bi, 0)),
            scratch_shapes=[pltpu.VMEM((b_tile, 1), jnp.float32)] * 3,
        ),
        compiler_params=pltpu.CompilerParams(
            dimension_semantics=("parallel", "arbitrary"),
            vmem_limit_bytes=vmem_limit),
    )(emb_p, w_p, cs_p, lbl_p)

    # TODO(synk): the (b_pad, 1) per-row output uses masked stores; a
    # lane-dense reshape would remove them but the win is negligible here.
    return jnp.mean(per_row[:B, 0])


def arcface_loss_ref(embeddings, weight, labels, *, scale=30.0, margin=0.5):
    """Pure-JAX reference matching the PyTorch forward (sqrt arg clamped)."""
    cos_m = math.cos(margin)
    sin_m = math.sin(margin)
    w_n = weight / jnp.maximum(
        jnp.linalg.norm(weight, axis=1, keepdims=True), 1e-12)
    cos_theta = embeddings @ w_n.T
    one_hot = jax.nn.one_hot(labels, weight.shape[0], dtype=jnp.float32) > 0
    sin_theta = jnp.sqrt(jnp.clip(1.0 - cos_theta ** 2, 0.0, 1.0))
    cos_theta_m = cos_theta * cos_m - sin_theta * sin_m
    logits = jnp.where(one_hot, cos_theta_m, cos_theta) * scale
    lse = jax.nn.logsumexp(logits, axis=1)
    tgt = jnp.take_along_axis(logits, labels[:, None], axis=1)[:, 0]
    return jnp.mean(lse - tgt)


if __name__ == "__main__":
    B, E, C = 24, 64, 200          # batch, embedding_size, num_classes
    key = jax.random.PRNGKey(0)
    k_emb, k_w, k_lbl = jax.random.split(key, 3)

    # Unit-normalized embeddings (typical ArcFace usage) so cos_theta ~ [-1, 1].
    emb = jax.random.normal(k_emb, (B, E), dtype=jnp.float32)
    emb = emb / jnp.linalg.norm(emb, axis=1, keepdims=True)

    # Xavier-normal init for the (num_classes, embedding_size) weight.
    xavier_std = math.sqrt(2.0 / (C + E))
    weight = jax.random.normal(k_w, (C, E), dtype=jnp.float32) * xavier_std

    labels = jax.random.randint(k_lbl, (B,), 0, C, dtype=jnp.int32)

    loss_ref = arcface_loss_ref(emb, weight, labels, scale=30.0, margin=0.5)

    # 1) Default tiling: single batch tile, single padded C tile.
    loss_default = jax.block_until_ready(
        arcface_loss(emb, weight, labels, scale=30.0, margin=0.5))

    # 2) Explicit small tiles: grid (3, 2) exercises the parallel batch axis,
    #    the streamed-C online logsumexp and the padded-class mask branch.
    loss_tiled = jax.block_until_ready(
        arcface_loss(emb, weight, labels, scale=30.0, margin=0.5,
                     b_tile=8, c_tile=128))

    assert jnp.isfinite(loss_default) and jnp.isfinite(loss_tiled)
    assert jnp.allclose(loss_default, loss_ref, rtol=1e-4, atol=1e-4), (
        loss_default, loss_ref)
    assert jnp.allclose(loss_tiled, loss_ref, rtol=1e-4, atol=1e-4), (
        loss_tiled, loss_ref)

    print("KERNEL_OK")
</pallas_src>

<mosaic_0001>
module attributes {stable_mosaic.version = 11 : i64} {
  func.func @_arcface_kernel(%arg0: i32, %arg1: i32, %arg2: memref<24x64xf32, #tpu.memory_space<vmem>>, %arg3: memref<256x64xf32, #tpu.memory_space<vmem>>, %arg4: memref<1x256xf32, #tpu.memory_space<vmem>>, %arg5: memref<24x1xi32, #tpu.memory_space<vmem>>, %arg6: memref<24x1xf32, #tpu.memory_space<vmem>>, %arg7: memref<24x1xf32, #tpu.memory_space<vmem>>, %arg8: memref<24x1xf32, #tpu.memory_space<vmem>>, %arg9: memref<24x1xf32, #tpu.memory_space<vmem>>) attributes {dimension_semantics = [#tpu.dimension_semantics<parallel>, #tpu.dimension_semantics<arbitrary>], iteration_bounds = array<i64: 1, 1>, scalar_prefetch = 0 : i64, scratch_operands = 3 : i64, tpu.core_type = #tpu.core_type<tc>, window_params = [{transform_indices = @transform_0, window_bounds = array<i64: 24, 64>}, {transform_indices = @transform_1, window_bounds = array<i64: 256, 64>}, {transform_indices = @transform_2, window_bounds = array<i64: 1, 256>}, {transform_indices = @transform_3, window_bounds = array<i64: 24, 1>}, {transform_indices = @transform_4, window_bounds = array<i64: 24, 1>}]} {
    %c0_i32 = arith.constant 0 : i32
    %0 = arith.cmpi eq, %arg1, %c0_i32 : i32
    %1 = arith.extui %0 : i1 to i32
    %c0_i32_0 = arith.constant 0 : i32
    %2 = arith.cmpi ne, %1, %c0_i32_0 : i32
    scf.if %2 {
      %cst_38 = arith.constant -1.000000e+30 : f32
      %75 = vector.broadcast %cst_38 : f32 to vector<24x1xf32>
      %c0_39 = arith.constant 0 : index
      %c0_40 = arith.constant 0 : index
      %76 = vector.load %arg7[%c0_39, %c0_40] : memref<24x1xf32, #tpu.memory_space<vmem>>, vector<24x1xf32>
      tpu.vector_store %arg7[%c0_39, %c0_40], %75 {strides = array<i32>} : memref<24x1xf32, #tpu.memory_space<vmem>>, vector<24x1xf32>,
      %cst_41 = arith.constant 0.000000e+00 : f32
      %77 = vector.broadcast %cst_41 : f32 to vector<24x1xf32>
      %c0_42 = arith.constant 0 : index
      %c0_43 = arith.constant 0 : index
      %78 = vector.load %arg8[%c0_42, %c0_43] : memref<24x1xf32, #tpu.memory_space<vmem>>, vector<24x1xf32>
      tpu.vector_store %arg8[%c0_42, %c0_43], %77 {strides = array<i32>} : memref<24x1xf32, #tpu.memory_space<vmem>>, vector<24x1xf32>,
      %cst_44 = arith.constant 0.000000e+00 : f32
      %79 = vector.broadcast %cst_44 : f32 to vector<24x1xf32>
      %c0_45 = arith.constant 0 : index
      %c0_46 = arith.constant 0 : index
      %80 = vector.load %arg9[%c0_45, %c0_46] : memref<24x1xf32, #tpu.memory_space<vmem>>, vector<24x1xf32>
      tpu.vector_store %arg9[%c0_45, %c0_46], %79 {strides = array<i32>} : memref<24x1xf32, #tpu.memory_space<vmem>>, vector<24x1xf32>,
    } else {
    }
    %c0 = arith.constant 0 : index
    %c0_1 = arith.constant 0 : index
    %3 = vector.load %arg2[%c0, %c0_1] : memref<24x64xf32, #tpu.memory_space<vmem>>, vector<24x64xf32>
    %c0_2 = arith.constant 0 : index
    %c0_3 = arith.constant 0 : index
    %4 = vector.load %arg3[%c0_2, %c0_3] : memref<256x64xf32, #tpu.memory_space<vmem>>, vector<256x64xf32>
    %cst = arith.constant dense<0.000000e+00> : vector<24x256xf32>
    %5 = tpu.matmul %3, %4, %cst {dimension_numbers = #tpu.dot_dimension_numbers<[1], [1], [0], [0], [0, 0, 1, 0], [], []>} : vector<24x64xf32>, vector<256x64xf32>, vector<24x256xf32> -> vector<24x256xf32>
    %c0_4 = arith.constant 0 : index
    %c0_5 = arith.constant 0 : index
    %6 = vector.load %arg4[%c0_4, %c0_5] : memref<1x256xf32, #tpu.memory_space<vmem>>, vector<1x256xf32>
    %7 = vector.broadcast %6 : vector<1x256xf32> to vector<24x256xf32>
    %8 = arith.mulf %5, %7 : vector<24x256xf32>
    %c0_6 = arith.constant 0 : index
    %c0_7 = arith.constant 0 : index
    %9 = vector.load %arg5[%c0_6, %c0_7] : memref<24x1xi32, #tpu.memory_space<vmem>>, vector<24x1xi32>
    %c256_i32 = arith.constant 256 : i32
    %10 = arith.muli %arg1, %c256_i32 : i32
    %11 = tpu.iota {dimensions = array<i32: 1>} : vector<24x256xi32>
    %12 = vector.broadcast %10 : i32 to vector<24x256xi32>
    %13 = arith.addi %12, %11 : vector<24x256xi32>
    %14 = vector.broadcast %9 : vector<24x1xi32> to vector<24x256xi32>
    %15 = arith.cmpi eq, %13, %14 : vector<24x256xi32>
    %cst_8 = arith.constant 0.000000e+00 : f32
    %16 = vector.broadcast %cst_8 : f32 to vector<24x256xf32>
    %17 = arith.select %15, %8, %16 : vector<24x256xi1>, vector<24x256xf32>
    %cst_9 = arith.constant dense<0.000000e+00> : vector<24xf32>
    %18 = vector.multi_reduction <add>, %17, %cst_9 [1] : vector<24x256xf32> to vector<24xf32>
    %19 = vector.shape_cast %18 : vector<24xf32> to vector<24x1xf32>
    %cst_10 = arith.constant 0.0333333351 : f32
    %20 = vector.broadcast %cst_10 : f32 to vector<24x1xf32>
    %21 = arith.mulf %19, %20 : vector<24x1xf32>
    %22 = arith.mulf %21, %21 : vector<24x1xf32>
    %cst_11 = arith.constant 1.000000e+00 : f32
    %23 = vector.broadcast %cst_11 : f32 to vector<24x1xf32>
    %24 = arith.subf %23, %22 : vector<24x1xf32>
    %cst_12 = arith.constant 0.000000e+00 : f32
    %cst_13 = arith.constant 1.000000e+00 : f32
    %25 = vector.broadcast %cst_12 : f32 to vector<24x1xf32>
    %26 = arith.maximumf %25, %24 : vector<24x1xf32>
    %27 = vector.broadcast %cst_13 : f32 to vector<24x1xf32>
    %28 = arith.minimumf %27, %26 : vector<24x1xf32>
    %29 = math.sqrt %28 : vector<24x1xf32>
    %cst_14 = arith.constant 0.87758255 : f32
    %30 = vector.broadcast %cst_14 : f32 to vector<24x1xf32>
    %31 = arith.mulf %21, %30 : vector<24x1xf32>
    %cst_15 = arith.constant 0.47942555 : f32
    %32 = vector.broadcast %cst_15 : f32 to vector<24x1xf32>
    %33 = arith.mulf %29, %32 : vector<24x1xf32>
    %34 = arith.subf %31, %33 : vector<24x1xf32>
    %cst_16 = arith.constant 3.000000e+01 : f32
    %35 = vector.broadcast %cst_16 : f32 to vector<24x1xf32>
    %36 = arith.mulf %34, %35 : vector<24x1xf32>
    %37 = vector.shape_cast %36 : vector<24x1xf32> to vector<24x1xf32>
    %38 = vector.broadcast %37 : vector<24x1xf32> to vector<24x256xf32>
    %39 = arith.select %15, %38, %8 : vector<24x256xi1>, vector<24x256xf32>
    %c0_i32_17 = arith.constant 0 : i32
    %40 = arith.cmpi eq, %arg1, %c0_i32_17 : i32
    %41 = arith.extui %40 : i1 to i32
    %c0_i32_18 = arith.constant 0 : i32
    %42 = arith.cmpi ne, %41, %c0_i32_18 : i32
    %43 = scf.if %42 -> (vector<24x256xf32>) {
      %c200_i32 = arith.constant 200 : i32
      %75 = vector.broadcast %c200_i32 : i32 to vector<24x256xi32>
      %76 = arith.cmpi slt, %13, %75 : vector<24x256xi32>
      %cst_38 = arith.constant -1.000000e+30 : f32
      %77 = vector.broadcast %cst_38 : f32 to vector<24x256xf32>
      %78 = arith.select %76, %39, %77 : vector<24x256xi1>, vector<24x256xf32>
      scf.yield %78 : vector<24x256xf32>
    } else {
      scf.yield %39 : vector<24x256xf32>
    }
    %c0_19 = arith.constant 0 : index
    %c0_20 = arith.constant 0 : index
    %44 = vector.load %arg7[%c0_19, %c0_20] : memref<24x1xf32, #tpu.memory_space<vmem>>, vector<24x1xf32>
    %cst_21 = arith.constant dense<0xFF800000> : vector<24xf32>
    %45 = vector.multi_reduction <maximumf>, %43, %cst_21 [1] : vector<24x256xf32> to vector<24xf32>
    %46 = vector.shape_cast %45 : vector<24xf32> to vector<24x1xf32>
    %47 = arith.maximumf %44, %46 : vector<24x1xf32>
    %48 = arith.subf %44, %47 : vector<24x1xf32>
    %49 = math.exp %48 : vector<24x1xf32>
    %50 = vector.broadcast %47 : vector<24x1xf32> to vector<24x256xf32>
    %51 = arith.subf %43, %50 : vector<24x256xf32>
    %52 = math.exp %51 : vector<24x256xf32>
    %cst_22 = arith.constant dense<0.000000e+00> : vector<24xf32>
    %53 = vector.multi_reduction <add>, %52, %cst_22 [1] : vector<24x256xf32> to vector<24xf32>
    %54 = vector.shape_cast %53 : vector<24xf32> to vector<24x1xf32>
    %c0_23 = arith.constant 0 : index
    %c0_24 = arith.constant 0 : index
    %55 = vector.load %arg8[%c0_23, %c0_24] : memref<24x1xf32, #tpu.memory_space<vmem>>, vector<24x1xf32>
    %56 = arith.mulf %49, %55 : vector<24x1xf32>
    %57 = arith.addf %56, %54 : vector<24x1xf32>
    %c256_i32_25 = arith.constant 256 : i32
    %58 = arith.muli %arg1, %c256_i32_25 : i32
    %59 = vector.broadcast %58 : i32 to vector<24x1xi32>
    %60 = arith.cmpi sge, %9, %59 : vector<24x1xi32>
    %c256_i32_26 = arith.constant 256 : i32
    %61 = arith.addi %58, %c256_i32_26 : i32
    %62 = vector.broadcast %61 : i32 to vector<24x1xi32>
    %63 = arith.cmpi slt, %9, %62 : vector<24x1xi32>
    %64 = arith.andi %60, %63 : vector<24x1xi1>
    %c0_27 = arith.constant 0 : index
    %c0_28 = arith.constant 0 : index
    %65 = vector.load %arg9[%c0_27, %c0_28] : memref<24x1xf32, #tpu.memory_space<vmem>>, vector<24x1xf32>
    %cst_29 = arith.constant 0.000000e+00 : f32
    %66 = vector.broadcast %cst_29 : f32 to vector<24x1xf32>
    %67 = arith.select %64, %36, %66 : vector<24x1xi1>, vector<24x1xf32>
    %68 = arith.addf %65, %67 : vector<24x1xf32>
    %c0_30 = arith.constant 0 : index
    %c0_31 = arith.constant 0 : index
    %69 = vector.load %arg7[%c0_30, %c0_31] : memref<24x1xf32, #tpu.memory_space<vmem>>, vector<24x1xf32>
    tpu.vector_store %arg7[%c0_30, %c0_31], %47 {strides = array<i32>} : memref<24x1xf32, #tpu.memory_space<vmem>>, vector<24x1xf32>,
    %c0_32 = arith.constant 0 : index
    %c0_33 = arith.constant 0 : index
    %70 = vector.load %arg8[%c0_32, %c0_33] : memref<24x1xf32, #tpu.memory_space<vmem>>, vector<24x1xf32>
    tpu.vector_store %arg8[%c0_32, %c0_33], %57 {strides = array<i32>} : memref<24x1xf32, #tpu.memory_space<vmem>>, vector<24x1xf32>,
    %c0_34 = arith.constant 0 : index
    %c0_35 = arith.constant 0 : index
    %71 = vector.load %arg9[%c0_34, %c0_35] : memref<24x1xf32, #tpu.memory_space<vmem>>, vector<24x1xf32>
    tpu.vector_store %arg9[%c0_34, %c0_35], %68 {strides = array<i32>} : memref<24x1xf32, #tpu.memory_space<vmem>>, vector<24x1xf32>,
    %c0_i32_36 = arith.constant 0 : i32
    %72 = arith.cmpi eq, %arg1, %c0_i32_36 : i32
    %73 = arith.extui %72 : i1 to i32
    %c0_i32_37 = arith.constant 0 : i32
    %74 = arith.cmpi ne, %73, %c0_i32_37 : i32
    scf.if %74 {
      %75 = math.log %57 : vector<24x1xf32>
      %76 = arith.addf %47, %75 : vector<24x1xf32>
      %77 = arith.subf %76, %68 : vector<24x1xf32>
      %c0_38 = arith.constant 0 : index
      %c0_39 = arith.constant 0 : index
      %78 = vector.load %arg6[%c0_38, %c0_39] : memref<24x1xf32, #tpu.memory_space<vmem>>, vector<24x1xf32>
      tpu.vector_store %arg6[%c0_38, %c0_39], %77 {strides = array<i32>} : memref<24x1xf32, #tpu.memory_space<vmem>>, vector<24x1xf32>,
    } else {
    }
    return
  }
  func.func @transform_0(%arg0: i32, %arg1: i32) -> (i32, i32) {
    %c0_i32 = arith.constant 0 : i32
    %c0_i32_0 = arith.constant 0 : i32
    return %arg0, %c0_i32 : i32, i32
  }
  func.func @transform_1(%arg0: i32, %arg1: i32) -> (i32, i32) {
    %c0_i32 = arith.constant 0 : i32
    %c0_i32_0 = arith.constant 0 : i32
    return %arg1, %c0_i32 : i32, i32
  }
  func.func @transform_2(%arg0: i32, %arg1: i32) -> (i32, i32) {
    %c0_i32 = arith.constant 0 : i32
    %c0_i32_0 = arith.constant 0 : i32
    return %c0_i32, %arg1 : i32, i32
  }
  func.func @transform_3(%arg0: i32, %arg1: i32) -> (i32, i32) {
    %c0_i32 = arith.constant 0 : i32
    %c0_i32_0 = arith.constant 0 : i32
    return %arg0, %c0_i32 : i32, i32
  }
  func.func @transform_4(%arg0: i32, %arg1: i32) -> (i32, i32) {
    %c0_i32 = arith.constant 0 : i32
    %c0_i32_0 = arith.constant 0 : i32
    return %arg0, %c0_i32 : i32, i32
  }
}

</mosaic_0001>

<bundles_post_ra>
// kernel: tpu_custom_call.1
= control target key start
LH: loop header
LB: loop body
LE: loop exit
PB: predicated region body
PF: predicated region fallthrough
CT: control target
= control target key end

     0   :  { %vm66_vm0 = vcmask 523264   ;;  %v660_v3 = vmov 0   ;;  %vm21_vm1 = vcmask 7168   ;;  %v661_v39 = vmov 0.0   ;;  %s1066_s1 = inlined_call_operand.vmem [shape: f32[256,64], index: 1, kind: input, shape index: {}]   ;;  %s1067_s0 = inlined_call_operand.vmem [shape: f32[24,64], index: 0, kind: input, shape index: {}]   ;;  %s1068_s3 = inlined_call_operand.vmem [shape: s32[24,1], index: 3, kind: input, shape index: {}]   ;;  %s1069_s2 = inlined_call_operand.vmem [shape: f32[1,256], index: 2, kind: input, shape index: {}]   ;;  %s1070_s4 = inlined_call_operand.vmem [shape: f32[24,1], index: 4, kind: output, shape index: {}]  }
   0x1   :  { %v65_v0 = vld [vmem:[%s1066_s1 + $0xf8] sm:$0xff]  ;;  %v64_v2 = vld [vmem:[%s1066_s1 + $0xf0] sm:$0xff]  ;;  %628 = vset.pattern.permute.xlu0 %v660_v3  ;;  %629 = vset.pattern.permute.xlu1 %v660_v3  ;;  %v63_v5 = vld [vmem:[%s1066_s1 + $0xe8] sm:$0xff]  ;;  %29 = vst.msk [vmem:[#allocation4 + $0x8] sm:$0xff] %vm21_vm1, %v661_v39  ;;  %v257_v40 = vlaneseq }
   0x2   :  { %v49_v1 = vld [vmem:[%s1066_s1 + $0x78] sm:$0xff]  ;;  %555 = vmatprep.subr.msk.mxu0 %vm66_vm0, %v65_v0  ;;  %593 = vmatprep.subr.msk.mxu1 %vm66_vm0, %v65_v0  ;;  %v48_v4 = vld [vmem:[%s1066_s1 + $0x70] sm:$0xff]  ;;  %v47_v6 = vld [vmem:[%s1066_s1 + $0x68] sm:$0xff]  ;;  %25 = vst.msk [vmem:[#allocation3] sm:$0xff] %vm21_vm1, %v661_v39 }
   0x3   :  { %556 = vmatpush3.xpose.msk.msra.mxu0 %vm66_vm0, %v49_v1  ;;  %609 = vmatpush3.xpose.msk.msra.mxu1 %vm66_vm0, %v49_v1  ;;  %v62_v7 = vld [vmem:[%s1066_s1 + $0xe0] sm:$0xff]  ;;  %v734_v10 = vld [vmem:[%s1067_s0 + $0x8] sm:$0xff]  ;;  %v61_v12 = vld [vmem:[%s1066_s1 + $0xd8] sm:$0xff]  ;;  %26 = vst.msk [vmem:[#allocation3 + $0x8] sm:$0xff] %vm21_vm1, %v661_v39  ;;  %v258_v41 = vshrl.u32 %v257_v40, 7  ;;  %v900_v46 = vand.u32 127, %v257_v40 }
   0x4   :  { %557 = vmatprep.subr.msk.mxu0 %vm66_vm0, %v64_v2  ;;  %594 = vmatprep.subr.msk.mxu1 %vm66_vm0, %v64_v2  ;;  %v724_v8 = vld [vmem:[%s1067_s0] sm:$0xff]  ;;  %v751_v13 = vld [vmem:[%s1068_s3 + $0x10] sm:$0xff]  ;;  %v760_v14 = vld [vmem:[%s1068_s3 + $0x8] sm:$0xff]  ;;  %27 = vst.msk [vmem:[#allocation3 + $0x10] sm:$0xff] %vm21_vm1, %v661_v39 }
   0x5   :  { %v46_v9 = vld [vmem:[%s1066_s1 + $0x60] sm:$0xff]  ;;  %587 = vmatprep.mubr.msk.f32.mxu0 %vm66_vm0, %v724_v8  ;;  %589 = vmatprep.mubr.msk.f32.mxu1 %vm66_vm0, %v734_v10  ;;  %v45_v15 = vld [vmem:[%s1066_s1 + $0x58] sm:$0xff]  ;;  %v60_v16 = vld [vmem:[%s1066_s1 + $0xd0] sm:$0xff]  ;;  %28 = vst.msk [vmem:[#allocation4] sm:$0xff] %vm21_vm1, %v661_v39  ;;  %v259_v43 = vsub.s32 0, %v258_v41  ;;  %v263_v45 = vsub.s32 1, %v258_v41 }
   0x6   :  { %v739_v11 = vld [vmem:[%s1068_s3] sm:$0xff]  ;;  %290 = vperm.xlu1 %629, %v751_v13   ;;  %v44_v17 = vld [vmem:[%s1066_s1 + $0x50] sm:$0xff]  ;;  %v59_v18 = vld [vmem:[%s1066_s1 + $0xc8] sm:$0xff]  ;;  %30 = vst.msk [vmem:[#allocation4 + $0x10] sm:$0xff] %vm21_vm1, %v661_v39  ;;  %v905_v50 = vadd.s32 128, %v900_v46  ;;  %vm469_vm11 = vcmp.ge.s32.totalorder %v760_v14, 0 }
   0x7   :  { %558 = vmatpush3.xpose.msk.msra.mxu0 %vm66_vm0, %v48_v4  ;;  %610 = vmatpush3.xpose.msk.msra.mxu1 %vm66_vm0, %v48_v4  ;;  %v43_v19 = vld [vmem:[%s1066_s1 + $0x48] sm:$0xff]  ;;  %v58_v20 = vld [vmem:[%s1066_s1 + $0xc0] sm:$0xff]  ;;  %v57_v22 = vld [vmem:[%s1066_s1 + $0xb8] sm:$0xff]  ;;  %vm474_vm13 = vcmp.lt.s32.totalorder %v760_v14, 256  ;;  %vm468_vm14 = vcmp.ge.s32.totalorder %v739_v11, 0  ;;  %vm473_vm15 = vcmp.lt.s32.totalorder %v739_v11, 256 }
   0x8   :  { %559 = vmatprep.subr.msk.mxu0 %vm66_vm0, %v63_v5  ;;  %595 = vmatprep.subr.msk.mxu1 %vm66_vm0, %v63_v5  ;;  %v42_v21 = vld [vmem:[%s1066_s1 + $0x40] sm:$0xff]  ;;  %v41_v23 = vld [vmem:[%s1066_s1 + $0x38] sm:$0xff]  ;;  %v56_v24 = vld [vmem:[%s1066_s1 + $0xb0] sm:$0xff] }
   0x9   :  { %284 = vperm.xlu0 %628, %v739_v11   ;;  %v40_v25 = vld [vmem:[%s1066_s1 + $0x30] sm:$0xff]  ;;  %v55_v26 = vld [vmem:[%s1066_s1 + $0xa8] sm:$0xff]  ;;  %v54_v28 = vld [vmem:[%s1066_s1 + $0xa0] sm:$0xff] }
   0xa   :  { %v39_v27 = vld [vmem:[%s1066_s1 + $0x28] sm:$0xff]  ;;  %v38_v29 = vld [vmem:[%s1066_s1 + $0x20] sm:$0xff]  ;;  %v53_v30 = vld [vmem:[%s1066_s1 + $0x98] sm:$0xff] }
   0xb   :  { %560 = vmatpush3.xpose.msk.msra.mxu0 %vm66_vm0, %v47_v6  ;;  %611 = vmatpush3.xpose.msk.msra.mxu1 %vm66_vm0, %v47_v6  ;;  %v37_v31 = vld [vmem:[%s1066_s1 + $0x18] sm:$0xff]  ;;  %v52_v32 = vld [vmem:[%s1066_s1 + $0x90] sm:$0xff]  ;;  %v51_v34 = vld [vmem:[%s1066_s1 + $0x88] sm:$0xff] }
   0xc   :  { %561 = vmatprep.subr.msk.mxu0 %vm66_vm0, %v62_v7  ;;  %596 = vmatprep.subr.msk.mxu1 %vm66_vm0, %v62_v7  ;;  %v36_v33 = vld [vmem:[%s1066_s1 + $0x10] sm:$0xff]  ;;  %v35_v35 = vld [vmem:[%s1066_s1 + $0x8] sm:$0xff]  ;;  %v50_v36 = vld [vmem:[%s1066_s1 + $0x80] sm:$0xff] }
   0xd   :  { %287 = vperm.xlu0 %628, %v760_v14   ;;  %v34_v37 = vld [vmem:[%s1066_s1] sm:$0xff]  ;;  %v33_v38 = vld [vmem:[%s1067_s0 + $0x10] sm:$0xff]  ;;  %v480_v11 = vld [vmem:[#allocation4 + $0x8] sm:$0xff] }
   0xe   :  { %v255_v44 = vld [vmem:[%s1069_s2] sm:$0x3]  ;;  %v479_v14 = vld [vmem:[#allocation4] sm:$0xff] }
   0xf   :  { %562 = vmatpush3.xpose.msk.msra.mxu0 %vm66_vm0, %v46_v9  ;;  %612 = vmatpush3.xpose.msk.msra.mxu1 %vm66_vm0, %v46_v9  ;;  %v260_v47 = vrot.slane %v255_v44, %v259_v43  ;;  %v264_v49 = vrot.slane %v255_v44, %v263_v45  ;;  %v662_v9 = vmov -1e+30  }
  0x10   :  { %563 = vmatprep.subr.msk.mxu0 %vm66_vm0, %v61_v12  ;;  %597 = vmatprep.subr.msk.mxu1 %vm66_vm0, %v61_v12  ;;  %23 = vst.msk [vmem:[#allocation2 + $0x8] sm:$0xff] %vm21_vm1, %v662_v9  ;;  %22 = vst.msk [vmem:[#allocation2] sm:$0xff] %vm21_vm1, %v662_v9 }
  0x11   :  { %24 = vst.msk [vmem:[#allocation2 + $0x10] sm:$0xff] %vm21_vm1, %v662_v9 }
  0x13   :  { %564 = vmatpush3.xpose.msk.msra.mxu0 %vm66_vm0, %v45_v15  ;;  %613 = vmatpush3.xpose.msk.msra.mxu1 %vm66_vm0, %v45_v15 }
  0x14   :  { %565 = vmatprep.subr.msk.mxu0 %vm66_vm0, %v60_v16  ;;  %598 = vmatprep.subr.msk.mxu1 %vm66_vm0, %v60_v16 }
  0x17   :  { %566 = vmatpush3.xpose.msk.msra.mxu0 %vm66_vm0, %v44_v17  ;;  %614 = vmatpush3.xpose.msk.msra.mxu1 %vm66_vm0, %v44_v17 }
  0x18   :  { %567 = vmatprep.subr.msk.mxu0 %vm66_vm0, %v59_v18  ;;  %599 = vmatprep.subr.msk.mxu1 %vm66_vm0, %v59_v18 }
  0x1b   :  { %568 = vmatpush3.xpose.msk.msra.mxu0 %vm66_vm0, %v43_v19  ;;  %615 = vmatpush3.xpose.msk.msra.mxu1 %vm66_vm0, %v43_v19 }
  0x1c   :  { %569 = vmatprep.subr.msk.mxu0 %vm66_vm0, %v58_v20  ;;  %600 = vmatprep.subr.msk.mxu1 %vm66_vm0, %v58_v20 }
  0x1f   :  { %570 = vmatpush3.xpose.msk.msra.mxu0 %vm66_vm0, %v42_v21  ;;  %616 = vmatpush3.xpose.msk.msra.mxu1 %vm66_vm0, %v42_v21 }
  0x20   :  { %571 = vmatprep.subr.msk.mxu0 %vm66_vm0, %v57_v22  ;;  %601 = vmatprep.subr.msk.mxu1 %vm66_vm0, %v57_v22 }
  0x23   :  { %572 = vmatpush3.xpose.msk.msra.mxu0 %vm66_vm0, %v41_v23  ;;  %617 = vmatpush3.xpose.msk.msra.mxu1 %vm66_vm0, %v41_v23 }
  0x24   :  { %573 = vmatprep.subr.msk.mxu0 %vm66_vm0, %v56_v24  ;;  %602 = vmatprep.subr.msk.mxu1 %vm66_vm0, %v56_v24 }
  0x27   :  { %574 = vmatpush3.xpose.msk.msra.mxu0 %vm66_vm0, %v40_v25  ;;  %618 = vmatpush3.xpose.msk.msra.mxu1 %vm66_vm0, %v40_v25 }
  0x28   :  { %575 = vmatprep.subr.msk.mxu0 %vm66_vm0, %v55_v26  ;;  %603 = vmatprep.subr.msk.mxu1 %vm66_vm0, %v55_v26 }
  0x2b   :  { %576 = vmatpush3.xpose.msk.msra.mxu0 %vm66_vm0, %v39_v27  ;;  %619 = vmatpush3.xpose.msk.msra.mxu1 %vm66_vm0, %v39_v27 }
  0x2c   :  { %577 = vmatprep.subr.msk.mxu0 %vm66_vm0, %v54_v28  ;;  %604 = vmatprep.subr.msk.mxu1 %vm66_vm0, %v54_v28 }
  0x2f   :  { %578 = vmatpush3.xpose.msk.msra.mxu0 %vm66_vm0, %v38_v29  ;;  %620 = vmatpush3.xpose.msk.msra.mxu1 %vm66_vm0, %v38_v29 }
  0x30   :  { %579 = vmatprep.subr.msk.mxu0 %vm66_vm0, %v53_v30  ;;  %605 = vmatprep.subr.msk.mxu1 %vm66_vm0, %v53_v30 }
  0x33   :  { %580 = vmatpush3.xpose.msk.msra.mxu0 %vm66_vm0, %v37_v31  ;;  %621 = vmatpush3.xpose.msk.msra.mxu1 %vm66_vm0, %v37_v31 }
  0x34   :  { %581 = vmatprep.subr.msk.mxu0 %vm66_vm0, %v52_v32  ;;  %606 = vmatprep.subr.msk.mxu1 %vm66_vm0, %v52_v32 }
  0x37   :  { %582 = vmatpush3.xpose.msk.msra.mxu0 %vm66_vm0, %v36_v33  ;;  %622 = vmatpush3.xpose.msk.msra.mxu1 %vm66_vm0, %v36_v33 }
  0x38   :  { %583 = vmatprep.subr.msk.mxu0 %vm66_vm0, %v51_v34  ;;  %607 = vmatprep.subr.msk.mxu1 %vm66_vm0, %v51_v34 }
  0x3b   :  { %584 = vmatpush3.xpose.msk.msra.mxu0 %vm66_vm0, %v35_v35  ;;  %623 = vmatpush3.xpose.msk.msra.mxu1 %vm66_vm0, %v35_v35 }
  0x3c   :  { %585 = vmatprep.subr.msk.mxu0 %vm66_vm0, %v50_v36  ;;  %608 = vmatprep.subr.msk.mxu1 %vm66_vm0, %v50_v36 }
  0x3f   :  { %586 = vmatpush3.xpose.msk.msra.mxu0 %vm66_vm0, %v34_v37  ;;  %624 = vmatpush3.xpose.msk.msra.mxu1 %vm66_vm0, %v34_v37 }
  0x42   :  { %588 = vmatmul.mubr.msk.f32.vlgmr.msra.gmra.mxu0 %vm66_vm0, %v724_v8  ;;  %590 = vmatmul.mubr.msk.f32.vlgmr.msra.gmra.mxu1 %vm66_vm0, %v734_v10 }
  0x43   :  { %591 = vmatprep.mubr.msk.f32.mxu1 %vm66_vm0, %v33_v38 }
  0x46   :  { %592 = vmatmul.mubr.msk.f32.gmra.mxu1 %vm66_vm0, %v33_v38  ;;  %vm966_vm0 = vmand %vm469_vm11, %vm474_vm13  ;;  %vm475_vm11 = vcmp.lt.s32.totalorder %v751_v13, 256 }
  0x81   :  { %v917_v59 = vpop.permute.xlu1 %290 }
  0x82   :  { %vm296_vm6 = vcmp.eq.s32.totalorder %v900_v46, %v917_v59  ;;  %vm1071_vm7 = vcmp.eq.s32.totalorder %v905_v50, %v917_v59 }
  0x84   :  { %v895_v42 = vpop.permute.xlu0 %284 }
  0x85   :  { %vm292_vm3 = vcmp.eq.s32.totalorder %v900_v46, %v895_v42  ;;  %vm293_vm4 = vcmp.eq.s32.totalorder %v905_v50, %v895_v42 }
  0x88   :  { %v902_v48 = vpop.permute.xlu0 %287 }
  0x89   :  { %vm294_vm2 = vcmp.eq.s32.totalorder %v900_v46, %v902_v48  ;;  %vm295_vm5 = vcmp.eq.s32.totalorder %v905_v50, %v902_v48 }
 0x102   :  { %v238_v51 = vpop.f32.mrf.mxu0  ;;  %v244_v52 = vpop.f32.mrf.mxu1 }
 0x103   :  { %v907_v53 = vmul.f32 %v260_v47, %v238_v51  ;;  %v909_v54 = vmul.f32 %v260_v47, %v244_v52 }
 0x104   :  { %v240_v55 = vpop.f32.mrf.mxu0  ;;  %v246_v56 = vpop.f32.mrf.mxu1 }
 0x105   :  { %v913_v57 = vmul.f32 %v264_v49, %v240_v55  ;;  %v915_v58 = vmul.f32 %v264_v49, %v246_v56  ;;  %v300_v61 = vsel %vm294_vm2, %v909_v54, 0.0  ;;  %v298_v0 = vsel %vm292_vm3, %v907_v53, 0.0 }
 0x106   :  { %v250_v60 = vpop.f32.mrf.mxu1 }
 0x107   :  { %v929_v62 = vmul.f32 %v260_v47, %v250_v60  ;;  %v301_v63 = vsel %vm295_vm5, %v915_v58, 0.0  ;;  %v299_v1 = vsel %vm293_vm4, %v913_v57, 0.0 }
 0x108   :  { %v252_v2 = vpop.f32.mrf.mxu1  ;;  %v307_v3 = vadd.f32 %v301_v63, %v300_v61  ;;  %v304_v4 = vadd.f32 %v299_v1, %v298_v0 }
 0x109   :  { %v947_v5 = vmul.f32 %v264_v49, %v252_v2  ;;  %v302_v6 = vsel %vm296_vm6, %v929_v62, 0.0 }
 0x10a   :  { %308 = vadd.xlane.f32.xlu0 %v307_v3  ;;  %305 = vadd.xlane.f32.xlu1 %v304_v4 }
 0x10b   :  { %v303_v7 = vsel %vm1071_vm7, %v947_v5, 0.0  ;;  %vm371_vm7 = vcmp.lt.s32.totalorder %v905_v50, 200 }
 0x10c   :  { %v310_v8 = vadd.f32 %v303_v7, %v302_v6 }
 0x10e   :  { %311 = vadd.xlane.f32.xlu0 %v310_v8 }
 0x193   :  { %v309_v10 = vpop.xlane.xlu0 %308  ;;  %v306_v12 = vpop.xlane.xlu1 %305 }
 0x194   :  { %v314_v15 = vmul.f32 0.033333335, %v309_v10  ;;  %v313_v16 = vmul.f32 0.033333335, %v306_v12 }
 0x196   :  { %v317_v17 = vmul.f32 %v314_v15, %v314_v15  ;;  %v316_v18 = vmul.f32 %v313_v16, %v313_v16  ;;  %v350_v40 = vmul.f32 0.87758255, %v314_v15  ;;  %v349_v45 = vmul.f32 0.87758255, %v313_v16 }
 0x197   :  { %v312_v19 = vpop.xlane.xlu0 %311 }
 0x198   :  { %v320_v20 = vsub.f32 1.0, %v317_v17  ;;  %v319_v21 = vsub.f32 1.0, %v316_v18  ;;  %v315_v22 = vmul.f32 0.033333335, %v312_v19 }
 0x19a   :  { %v323_v23 = vmax.f32 %v320_v20, 0.0  ;;  %v322_v24 = vmax.f32 %v319_v21, 0.0  ;;  %v318_v25 = vmul.f32 %v315_v22, %v315_v22  ;;  %v351_v2 = vmul.f32 0.87758255, %v315_v22  ;;  %v394_v22 = vld [vmem:[#allocation2 + $0x8] sm:$0xff] }
 0x19c   :  { %v326_v26 = vmin.f32 %v323_v23, 1.0  ;;  %v325_v27 = vmin.f32 %v322_v24, 1.0  ;;  %v321_v28 = vsub.f32 1.0, %v318_v25  ;;  %v393_v24 = vld [vmem:[#allocation2] sm:$0xff] }
 0x19e   :  { %630 = vrsqrt.f32 %v326_v26  ;;  %v324_v29 = vmax.f32 %v321_v28, 0.0  ;;  %vm337_vm8 = vcmp.eq.f32.partialorder %v326_v26, inf  ;;  %v340_v34 = vand.u32 2147483648, %v326_v26 }
 0x19f   :  { %632 = vrsqrt.f32 %v325_v27  ;;  %vm339_vm9 = vcmp.eq.f32.partialorder %v326_v26, 0.0  ;;  %vm330_vm10 = vcmp.eq.f32.partialorder %v325_v27, inf  ;;  %v333_v37 = vand.u32 2147483648, %v325_v27 }
 0x1a0   :  { %v327_v30 = vmin.f32 %v324_v29, 1.0  ;;  %vm332_vm12 = vcmp.eq.f32.partialorder %v325_v27, 0.0 }
 0x1a2   :  { %634 = vrsqrt.f32 %v327_v30  ;;  %v347_v56 = vand.u32 2147483648, %v327_v30 }
 0x1ab   :  { %v631_v31 = vpop.eup %630 }
 0x1ac   :  { %v633_v32 = vpop.eup %632  ;;  %v336_v33 = vmul.f32 %v631_v31, %v326_v26 }
 0x1ad   :  { %v329_v35 = vmul.f32 %v633_v32, %v325_v27 }
 0x1ae   :  { %v338_v36 = vsel %vm337_vm8, %v326_v26, %v336_v33  ;;  %vm470_vm8 = vcmp.ge.s32.totalorder %v751_v13, 0 }
 0x1af   :  { %v341_v38 = vsel %vm339_vm9, %v340_v34, %v338_v36  ;;  %v331_v39 = vsel %vm330_vm10, %v325_v27, %v329_v35  ;;  %v635_v44 = vpop.eup %634  ;;  %vm344_vm9 = vcmp.eq.f32.partialorder %v327_v30, inf  ;;  %vm971_vm10 = vmand %vm468_vm14, %vm473_vm15 }
 0x1b0   :  { %v353_v41 = vmul.f32 0.47942555, %v341_v38  ;;  %v334_v43 = vsel %vm332_vm12, %v333_v37, %v331_v39  ;;  %v343_v51 = vmul.f32 %v635_v44, %v327_v30  ;;  %vm346_vm12 = vcmp.eq.f32.partialorder %v327_v30, 0.0 }
 0x1b1   :  { %v352_v47 = vmul.f32 0.47942555, %v334_v43 }
 0x1b2   :  { %v356_v49 = vsub.f32 %v350_v40, %v353_v41  ;;  %v345_v63 = vsel %vm344_vm9, %v327_v30, %v343_v51 }
 0x1b3   :  { %v355_v55 = vsub.f32 %v349_v45, %v352_v47  ;;  %v348_v1 = vsel %vm346_vm12, %v347_v56, %v345_v63 }
 0x1b4   :  { %v359_v61 = vmul.f32 30.0, %v356_v49  ;;  %v354_v4 = vmul.f32 0.47942555, %v348_v1  ;;  %v460_v1 = vld [vmem:[#allocation3 + $0x8] sm:$0xff] }
 0x1b5   :  { %v358_v0 = vmul.f32 30.0, %v355_v55 }
 0x1b6   :  { %v483_v3 = vsel %vm966_vm0, %v359_v61, 0.0  ;;  %v363_v6 = vsel %vm294_vm2, %v359_v61, %v909_v54  ;;  %v364_v7 = vsel %vm295_vm5, %v359_v61, %v915_v58  ;;  %v357_v54 = vsub.f32 %v351_v2, %v354_v4  ;;  %vm478_vm2 = vmand %vm470_vm8, %vm475_vm11  ;;  %v481_v58 = vld [vmem:[#allocation4 + $0x10] sm:$0xff] }
 0x1b7   :  { %v987_v8 = vadd.f32 %v483_v3, %v480_v11  ;;  %v482_v9 = vsel %vm971_vm10, %v358_v0, 0.0  ;;  %v375_v10 = vsel %vm371_vm7, %v364_v7, -1e+30  ;;  %v361_v12 = vsel %vm292_vm3, %v358_v0, %v907_v53  ;;  %v459_v3 = vld [vmem:[#allocation3] sm:$0xff] }
 0x1b8   :  { %v997_v15 = vadd.f32 %v482_v9, %v479_v14  ;;  %v399_v16 = vmax.f32 %v363_v6, %v375_v10  ;;  %v362_v48 = vsel %vm293_vm4, %v358_v0, %v913_v57  ;;  %v360_v17 = vmul.f32 30.0, %v357_v54  ;;  %v461_v54 = vld [vmem:[#allocation3 + $0x10] sm:$0xff] }
 0x1b9   :  { %496 = vst.msk [vmem:[#allocation4 + $0x8] sm:$0xff] %vm21_vm1, %v987_v8  ;;  %v373_v53 = vsel %vm371_vm7, %v362_v48, -1e+30  ;;  %vm1076_vm3 = vcmp.eq.s32.totalorder %v905_v50, %v917_v59  ;;  %v395_v50 = vld [vmem:[#allocation2 + $0x10] sm:$0xff] }
 0x1ba   :  { %495 = vst.msk [vmem:[#allocation4] sm:$0xff] %vm21_vm1, %v997_v15  ;;  %400 = vmax.xlane.f32.xlu0 %v399_v16  ;;  %v396_v18 = vmax.f32 %v361_v12, %v373_v53  ;;  %v484_v42 = vsel %vm478_vm2, %v360_v17, 0.0  ;;  %v365_v13 = vsel %vm296_vm6, %v360_v17, %v929_v62  ;;  %v366_v57 = vsel %vm1076_vm3, %v360_v17, %v947_v5 }
 0x1bb   :  { %v1021_v19 = vadd.f32 %v484_v42, %v481_v58  ;;  %v377_v20 = vsel %vm371_vm7, %v366_v57, -1e+30 }
 0x1bc   :  { %397 = vmax.xlane.f32.xlu1 %v396_v18  ;;  %v402_v21 = vmax.f32 %v365_v13, %v377_v20 }
 0x1bd   :  { %497 = vst.msk [vmem:[#allocation4 + $0x10] sm:$0xff] %vm21_vm1, %v1021_v19 }
 0x1c0   :  { %403 = vmax.xlane.f32.xlu1 %v402_v21 }
 0x243   :  { %v401_v23 = vpop.xlane.xlu0 %400 }
 0x244   :  { %v1027_v46 = vmax.f32 %v394_v22, %v401_v23 }
 0x245   :  { %v398_v62 = vpop.xlane.xlu1 %397 }
 0x246   :  { %490 = vst.msk [vmem:[#allocation2 + $0x8] sm:$0xff] %vm21_vm1, %v1027_v46  ;;  %v1031_v59 = vmax.f32 %v393_v24, %v398_v62  ;;  %424 = vperm.xlu1 %629, %v1027_v46   ;;  %v409_v56 = vsub.f32 %v394_v22, %v1027_v46 }
 0x248   :  { %489 = vst.msk [vmem:[#allocation2] sm:$0xff] %vm21_vm1, %v1031_v59  ;;  %419 = vperm.xlu0 %628, %v1031_v59   ;;  %v408_v60 = vsub.f32 %v393_v24, %v1031_v59  ;;  %v413_v11 = vmul.f32 1.442695, %v409_v56 }
 0x249   :  { %v404_v5 = vpop.xlane.xlu1 %403 }
 0x24a   :  { %v1037_v25 = vmax.f32 %v395_v50, %v404_v5  ;;  %v411_v61 = vmul.f32 1.442695, %v408_v60 }
 0x24c   :  { %491 = vst.msk [vmem:[#allocation2 + $0x10] sm:$0xff] %vm21_vm1, %v1037_v25  ;;  %429 = vperm.xlu1 %629, %v1037_v25   ;;  %v410_v63 = vsub.f32 %v395_v50, %v1037_v25 }
 0x24e   :  { %v415_v14 = vmul.f32 1.442695, %v410_v63 }
 0x2c1   :  { %v425_v26 = vpop.permute.xlu1 %424 }
 0x2c2   :  { %v434_v27 = vsub.f32 %v363_v6, %v425_v26  ;;  %v435_v28 = vsub.f32 %v375_v10, %v425_v26 }
 0x2c3   :  { %v420_v29 = vpop.permute.xlu0 %419 }
 0x2c4   :  { %v432_v30 = vsub.f32 %v361_v12, %v420_v29  ;;  %v433_v31 = vsub.f32 %v373_v53, %v420_v29  ;;  %v442_v32 = vmul.f32 1.442695, %v434_v27  ;;  %v444_v33 = vmul.f32 1.442695, %v435_v28 }
 0x2c6   :  { %v438_v34 = vmul.f32 1.442695, %v432_v30  ;;  %v440_v35 = vmul.f32 1.442695, %v433_v31  ;;  %636 = vpow2.f32 %v442_v32 }
 0x2c7   :  { %638 = vpow2.f32 %v444_v33  ;;  %v430_v36 = vpop.permute.xlu1 %429 }
 0x2c8   :  { %640 = vpow2.f32 %v438_v34  ;;  %v436_v37 = vsub.f32 %v365_v13, %v430_v36  ;;  %v437_v38 = vsub.f32 %v377_v20, %v430_v36 }
 0x2c9   :  { %642 = vpow2.f32 %v440_v35 }
 0x2ca   :  { %v446_v39 = vmul.f32 1.442695, %v436_v37  ;;  %v448_v40 = vmul.f32 1.442695, %v437_v38 }
 0x2cc   :  { %644 = vpow2.f32 %v446_v39 }
 0x2cd   :  { %646 = vpow2.f32 %v448_v40 }
 0x2ce   :  { %648 = vpow2.f32 %v413_v11 }
 0x2cf   :  { %650 = vpow2.f32 %v411_v61 }
 0x2d0   :  { %652 = vpow2.f32 %v415_v14 }
 0x2d3   :  { %v637_v41 = vpop.eup %636 }
 0x2d4   :  { %v639_v43 = vpop.eup %638 }
 0x2d5   :  { %v641_v44 = vpop.eup %640  ;;  %v453_v45 = vadd.f32 %v639_v43, %v637_v41 }
 0x2d6   :  { %v643_v47 = vpop.eup %642 }
 0x2d7   :  { %v450_v49 = vadd.f32 %v643_v47, %v641_v44  ;;  %454 = vadd.xlane.f32.xlu1 %v453_v45 }
 0x2d9   :  { %v645_v51 = vpop.eup %644  ;;  %451 = vadd.xlane.f32.xlu0 %v450_v49 }
 0x2da   :  { %v647_v52 = vpop.eup %646 }
 0x2db   :  { %v456_v55 = vadd.f32 %v647_v52, %v645_v51  ;;  %v649_v0 = vpop.eup %648 }
 0x2dc   :  { %v651_v2 = vpop.eup %650  ;;  %v463_v4 = vmul.f32 %v649_v0, %v460_v1 }
 0x2dd   :  { %457 = vadd.xlane.f32.xlu0 %v456_v55  ;;  %v462_v7 = vmul.f32 %v651_v2, %v459_v3  ;;  %v653_v10 = vpop.eup %652 }
 0x2de   :  { %v464_v48 = vmul.f32 %v653_v10, %v461_v54 }
 0x360   :  { %v455_v6 = vpop.xlane.xlu1 %454 }
 0x361   :  { %v466_v9 = vadd.f32 %v463_v4, %v455_v6 }
 0x362   :  { %v452_v12 = vpop.xlane.xlu0 %451 }
 0x363   :  { %v465_v16 = vadd.f32 %v462_v7, %v452_v12  ;;  %493 = vst.msk [vmem:[#allocation3 + $0x8] sm:$0xff] %vm21_vm1, %v466_v9  ;;  %654 = vlog2.f32 %v466_v9 }
 0x365   :  { %492 = vst.msk [vmem:[#allocation3] sm:$0xff] %vm21_vm1, %v465_v16  ;;  %656 = vlog2.f32 %v465_v16 }
 0x366   :  { %v458_v53 = vpop.xlane.xlu0 %457 }
 0x367   :  { %v467_v58 = vadd.f32 %v464_v48, %v458_v53 }
 0x369   :  { %494 = vst.msk [vmem:[#allocation3 + $0x10] sm:$0xff] %vm21_vm1, %v467_v58  ;;  %658 = vlog2.f32 %v467_v58 }
 0x370   :  { %v655_v17 = vpop.eup %654 }
 0x371   :  { %v504_v18 = vmul.f32 0.6931472, %v655_v17 }
 0x372   :  { %v657_v42 = vpop.eup %656 }
 0x373   :  { %v502_v13 = vmul.f32 0.6931472, %v657_v42  ;;  %v508_v57 = vadd.f32 %v504_v18, %v1027_v46 }
 0x375   :  { %v507_v20 = vadd.f32 %v502_v13, %v1031_v59  ;;  %v511_v21 = vsub.f32 %v508_v57, %v987_v8 }
 0x376   :  { %v659_v22 = vpop.eup %658 }
 0x377   :  { %v510_v23 = vsub.f32 %v507_v20, %v997_v15  ;;  %514 = vst.msk [vmem:[%s1070_s4 + $0x8] sm:$0xff] %vm21_vm1, %v511_v21  ;;  %v506_v24 = vmul.f32 0.6931472, %v659_v22 }
 0x379   :  { %513 = vst.msk [vmem:[%s1070_s4] sm:$0xff] %vm21_vm1, %v510_v23  ;;  %v509_v46 = vadd.f32 %v506_v24, %v1037_v25 }
 0x37b   :  { %v512_v62 = vsub.f32 %v509_v46, %v1021_v19 }
 0x37d   :  { %515 = vst.msk [vmem:[%s1070_s4 + $0x10] sm:$0xff] %vm21_vm1, %v512_v62 }

</bundles_post_ra>
